<compile_context>
chip_gen: v6e
topology: v6e:2x2x1
jax: 0.10.0
libtpu: 0.0.40
codegen_flags: <defaults>
</compile_context>

<pallas_src>
import jax
import jax.numpy as jnp
from jax.experimental import pallas as pl
from jax.experimental.pallas import tpu as pltpu


def base_core_kernel(x_ref, c_ref, feats_ref, iatt_ref,
                     w_fused_ref, b_fused_ref, w_alpha_ref,
                     w_a2c_ref, b_a2c_ref,
                     nh_ref, nc_ref):
    f32 = jnp.float32
    R = nh_ref.shape[-1]                          # rnn_size (static)

    x = x_ref[...]                                # (TB, E+R)  native dtype
    feats = feats_ref[...]                        # (TB, S, R) native dtype
    iatt = iatt_ref[...]                          # (TB, S, A) native dtype

    # ---- fused i2h + h2h + h2att: one MXU matmul, f32 accumulation --------
    fused = (jnp.dot(x, w_fused_ref[...], preferred_element_type=f32)
             + b_fused_ref[...].astype(f32))      # (TB, 5R+A) f32
    all_sums = fused[:, :5 * R]                   # (TB, 5R)
    att_h = fused[:, 5 * R:]                      # (TB, A)

    # ---- BaseAttention -----------------------------------------------------
    # Keep the big (TB,S,*) elementwise work in the input dtype (bf16-capable
    # VPU/EUP on v6e/v7x); reductions accumulate in f32.
    dot = jnp.tanh(iatt + att_h.astype(iatt.dtype)[:, None, :])      # (TB,S,A)
    w_alpha = w_alpha_ref[...].astype(dot.dtype)                     # (1, A)
    # alpha_net (A -> 1) as VPU mul + lane reduce; b_alpha omitted
    # (softmax(x + c) == softmax(x)). scores stay lane-dense (TB, S).
    scores = jnp.sum(dot * w_alpha[None, :, :], axis=-1, dtype=f32)  # (TB, S)

    m = jnp.max(scores, axis=-1, keepdims=True)
    e = jnp.exp(scores - m)
    denom = jnp.sum(e, axis=-1, keepdims=True)
    weight = e * pl.reciprocal(denom, approx=True)                   # (TB, S)

    # att_res[b,r] = sum_s weight[b,s] * feats[b,s,r]
    # (VPU mul + sublane reduce with f32 accumulation; no tiny MXU bmm.)
    att_res = jnp.sum(weight.astype(feats.dtype)[:, :, None] * feats,
                      axis=1, dtype=f32)                             # (TB, R)

    # ---- LSTM-ish cell -----------------------------------------------------
    sig = jax.nn.sigmoid(all_sums[:, :3 * R])
    in_gate = sig[:, :R]
    forget_gate = sig[:, R:2 * R]
    out_gate = sig[:, 2 * R:3 * R]

    a2c = (jnp.dot(att_res.astype(w_a2c_ref.dtype), w_a2c_ref[...],
                   preferred_element_type=f32)
           + b_a2c_ref[...].astype(f32))                             # (TB, 2R)
    in_tf = all_sums[:, 3 * R:5 * R] + a2c
    in_tf = jnp.maximum(in_tf[:, :R], in_tf[:, R:2 * R])

    next_c = forget_gate * c_ref[...].astype(f32) + in_gate * in_tf
    next_h = out_gate * jnp.tanh(next_c)

    nh_ref[...] = next_h.astype(nh_ref.dtype)
    nc_ref[...] = next_c.astype(nc_ref.dtype)


def _vmem_capacity_bytes():
    try:
        info = pltpu.get_tpu_info()
        cap = int(getattr(info, "vmem_capacity_bytes", 0) or 0)
        if cap > 0:
            return cap
    except Exception:
        pass
    return 64 * 1024 * 1024   # conservative default (v7x per-TC VMEM)


def base_core_forward(h_prev, c_prev, xt, att_feats, internal_att_feats,
                      w_h2att, b_h2att, w_alpha, b_alpha,
                      w_i2h, b_i2h, w_h2h, b_h2h, w_a2c, b_a2c,
                      tile_b=None):
    """BaseCore.forward, stage_id == 1 path.

    Returns (output, (next_h[None], next_c[None]), None) like the PyTorch
    module (dropout is identity in eval mode). `b_alpha` is accepted for
    interface parity but unused: a constant added before softmax is a no-op.
    next_c is returned in float32 so the recurrent cell state never
    round-trips through bf16.
    """
    del b_alpha  # softmax-invariant

    B, R = h_prev.shape
    S = att_feats.shape[1]
    A = internal_att_feats.shape[2]
    E = xt.shape[1]
    h_dtype = h_prev.dtype
    c_out_dtype = jnp.promote_types(c_prev.dtype, jnp.float32)

    # Fuse the three tiny-K matmuls (i2h, h2h, h2att) into one MXU call:
    #   [xt, h] @ [[w_i2h, 0      ],
    #              [w_h2h, w_h2att]]  ->  [all_input_sums | att_h]
    w_dtype = w_i2h.dtype
    x_cat = jnp.concatenate([xt, h_prev], axis=1)                       # (B, E+R)
    w_fused = jnp.concatenate(
        [jnp.concatenate([w_i2h, jnp.zeros((E, A), w_dtype)], axis=1),
         jnp.concatenate([w_h2h, w_h2att.astype(w_dtype)], axis=1)],
        axis=0)                                                          # (E+R, 5R+A)
    b_fused = jnp.concatenate(
        [(b_i2h + b_h2h).astype(jnp.float32),
         b_h2att.astype(jnp.float32)], axis=1)                           # (1, 5R+A)

    # ---- VMEM budget & batch-tile sizing ------------------------------------
    vmem_cap = _vmem_capacity_bytes()
    vmem_limit = max(32 * 1024 * 1024,
                     min((vmem_cap * 3) // 4, 100 * 1024 * 1024))
    if tile_b is None:
        feats_it = jnp.dtype(att_feats.dtype).itemsize
        iatt_it = jnp.dtype(internal_att_feats.dtype).itemsize
        # Two big streaming inputs, double-buffered, plus the in-kernel f32
        # temporaries (tanh `dot` and the weighted-feats product).
        per_row = (2 * S * (R * feats_it + A * iatt_it)
                   + S * (R + A) * 4)
        budget = vmem_limit // 2
        tile_b = max(8, min(512, budget // max(per_row, 1)))
        tile_b -= tile_b % 8
        if B <= 8:
            tile_b = B              # block == full batch dim (no sublane pad)
        else:
            # Keep the grid >= 2 steps so both v7x TensorCores get work.
            half = (((B + 1) // 2 + 7) // 8) * 8
            tile_b = max(8, min(tile_b, half))

    grid = (pl.cdiv(B, tile_b),)
    # No host-side jnp.pad of the big tensors: the ragged last batch tile is
    # handled by Pallas' out-of-bounds reads / masked writes; rows are
    # independent so garbage rows never contaminate valid ones.

    full = lambda b: (0, 0)
    out_shapes = (jax.ShapeDtypeStruct((B, R), h_dtype),
                  jax.ShapeDtypeStruct((B, R), c_out_dtype))

    next_h, next_c = pl.pallas_call(
        base_core_kernel,
        out_shape=out_shapes,
        grid_spec=pltpu.PrefetchScalarGridSpec(
            num_scalar_prefetch=0,
            grid=grid,
            in_specs=[
                pl.BlockSpec((tile_b, E + R), lambda b: (b, 0)),       # [xt, h]
                pl.BlockSpec((tile_b, R), lambda b: (b, 0)),           # c_prev
                pl.BlockSpec((tile_b, S, R), lambda b: (b, 0, 0)),     # att_feats
                pl.BlockSpec((tile_b, S, A), lambda b: (b, 0, 0)),     # internal_att
                pl.BlockSpec((E + R, 5 * R + A), full),                # w_fused
                pl.BlockSpec((1, 5 * R + A), full),                    # b_fused
                pl.BlockSpec((1, A), full),                            # w_alpha
                pl.BlockSpec((R, 2 * R), full),                        # w_a2c
                pl.BlockSpec((1, 2 * R), full),                        # b_a2c
            ],
            out_specs=[
                pl.BlockSpec((tile_b, R), lambda b: (b, 0)),
                pl.BlockSpec((tile_b, R), lambda b: (b, 0)),
            ],
        ),
        compiler_params=pltpu.CompilerParams(
            dimension_semantics=("parallel",),
            vmem_limit_bytes=vmem_limit,
        ),
    )(x_cat, c_prev, att_feats, internal_att_feats,
      w_fused, b_fused, w_alpha, w_a2c, b_a2c)

    output = next_h                      # nn.Dropout == identity (eval mode)
    state = (next_h[None], next_c[None])
    rel_res = None                       # stage_id == 1
    return output, state, rel_res


# ---------------------------- pure-JAX reference ----------------------------
def reference_forward(h_prev, c_prev, xt, att_feats, internal_att_feats,
                      w_h2att, b_h2att, w_alpha, b_alpha,
                      w_i2h, b_i2h, w_h2h, b_h2h, w_a2c, b_a2c):
    att_h = h_prev @ w_h2att + b_h2att
    dot = jnp.tanh(internal_att_feats + att_h[:, None, :])
    scores = jnp.sum(dot * w_alpha[None, :, :], axis=-1) + b_alpha[0, 0]
    weight = jax.nn.softmax(scores, axis=-1)
    att_res = jnp.einsum("bs,bsr->br", weight, att_feats)

    all_sums = xt @ w_i2h + b_i2h + h_prev @ w_h2h + b_h2h
    R = h_prev.shape[1]
    sig = jax.nn.sigmoid(all_sums[:, :3 * R])
    in_gate, forget_gate, out_gate = sig[:, :R], sig[:, R:2 * R], sig[:, 2 * R:3 * R]
    in_tf = all_sums[:, 3 * R:] + (att_res @ w_a2c + b_a2c)
    in_tf = jnp.maximum(in_tf[:, :R], in_tf[:, R:])
    next_c = forget_gate * c_prev + in_gate * in_tf
    next_h = out_gate * jnp.tanh(next_c)
    return next_h, next_c


def _run_case(seed, B, att_size, rnn_size, att_hid, in_enc):
    ks = jax.random.split(jax.random.PRNGKey(seed), 15)

    h_prev = jax.random.normal(ks[0], (B, rnn_size), dtype=jnp.float32)
    c_prev = jax.random.normal(ks[1], (B, rnn_size), dtype=jnp.float32)
    xt = jax.random.normal(ks[2], (B, in_enc), dtype=jnp.float32)
    att_feats = jax.random.normal(ks[3], (B, att_size, rnn_size), dtype=jnp.float32)
    internal_att_feats = jax.random.normal(ks[4], (B, att_size, att_hid),
                                           dtype=jnp.float32)

    # Parameters (stored pre-transposed vs PyTorch's (out, in) convention).
    w_h2att = 0.1 * jax.random.normal(ks[5], (rnn_size, att_hid), dtype=jnp.float32)
    b_h2att = 0.1 * jax.random.normal(ks[6], (1, att_hid), dtype=jnp.float32)
    w_alpha = 0.1 * jax.random.normal(ks[7], (1, att_hid), dtype=jnp.float32)
    b_alpha = 0.1 * jax.random.normal(ks[8], (1, 1), dtype=jnp.float32)
    w_i2h = 0.1 * jax.random.normal(ks[9], (in_enc, 5 * rnn_size), dtype=jnp.float32)
    b_i2h = 0.1 * jax.random.normal(ks[10], (1, 5 * rnn_size), dtype=jnp.float32)
    w_h2h = 0.1 * jax.random.normal(ks[11], (rnn_size, 5 * rnn_size), dtype=jnp.float32)
    b_h2h = 0.1 * jax.random.normal(ks[12], (1, 5 * rnn_size), dtype=jnp.float32)
    w_a2c = 0.1 * jax.random.normal(ks[13], (rnn_size, 2 * rnn_size), dtype=jnp.float32)
    b_a2c = 0.1 * jax.random.normal(ks[14], (1, 2 * rnn_size), dtype=jnp.float32)

    output, state, rel_res = base_core_forward(
        h_prev, c_prev, xt, att_feats, internal_att_feats,
        w_h2att, b_h2att, w_alpha, b_alpha,
        w_i2h, b_i2h, w_h2h, b_h2h, w_a2c, b_a2c)
    output = jax.block_until_ready(output)
    next_h, next_c = state[0][0], state[1][0]

    ref_h, ref_c = reference_forward(
        h_prev, c_prev, xt, att_feats, internal_att_feats,
        w_h2att, b_h2att, w_alpha, b_alpha,
        w_i2h, b_i2h, w_h2h, b_h2h, w_a2c, b_a2c)

    assert output.shape == (B, rnn_size)
    assert next_c.shape == (B, rnn_size)
    assert rel_res is None
    # approx=True reciprocal in softmax -> slightly looser tolerance.
    assert jnp.allclose(next_h, ref_h, atol=5e-3, rtol=5e-3), f"next_h mismatch B={B}"
    assert jnp.allclose(next_c, ref_c, atol=5e-3, rtol=5e-3), f"next_c mismatch B={B}"


if __name__ == "__main__":
    # Small shapes consistent with the module:
    #   rnn_size = att_hid_size = input_encoding_size = 32, att_size = 8.
    _run_case(seed=0, B=2, att_size=8, rnn_size=32, att_hid=32, in_enc=32)
    # Ragged-batch case: B not a multiple of the 8-row tile -> exercises the
    # no-pad / masked-last-block path and a 2-step grid (v7x megacore).
    _run_case(seed=0, B=10, att_size=8, rnn_size=32, att_hid=32, in_enc=32)
    print("KERNEL_OK")
</pallas_src>

<mosaic_0001>
module attributes {stable_mosaic.version = 11 : i64} {
  func.func @base_core_kernel(%arg0: i32, %arg1: memref<2x64xf32, #tpu.memory_space<vmem>>, %arg2: memref<2x32xf32, #tpu.memory_space<vmem>>, %arg3: memref<2x8x32xf32, #tpu.memory_space<vmem>>, %arg4: memref<2x8x32xf32, #tpu.memory_space<vmem>>, %arg5: memref<64x192xf32, #tpu.memory_space<vmem>>, %arg6: memref<1x192xf32, #tpu.memory_space<vmem>>, %arg7: memref<1x32xf32, #tpu.memory_space<vmem>>, %arg8: memref<32x64xf32, #tpu.memory_space<vmem>>, %arg9: memref<1x64xf32, #tpu.memory_space<vmem>>, %arg10: memref<2x32xf32, #tpu.memory_space<vmem>>, %arg11: memref<2x32xf32, #tpu.memory_space<vmem>>) attributes {dimension_semantics = [#tpu.dimension_semantics<parallel>], iteration_bounds = array<i64: 1>, scalar_prefetch = 0 : i64, scratch_operands = 0 : i64, tpu.core_type = #tpu.core_type<tc>, window_params = [{transform_indices = @transform_0, window_bounds = array<i64: 2, 64>}, {transform_indices = @transform_1, window_bounds = array<i64: 2, 32>}, {transform_indices = @transform_2, window_bounds = array<i64: 2, 8, 32>}, {transform_indices = @transform_3, window_bounds = array<i64: 2, 8, 32>}, {pipeline_mode = #tpu.pipeline_mode<synchronous>, transform_indices = @transform_4, window_bounds = array<i64: 64, 192>}, {pipeline_mode = #tpu.pipeline_mode<synchronous>, transform_indices = @transform_5, window_bounds = array<i64: 1, 192>}, {pipeline_mode = #tpu.pipeline_mode<synchronous>, transform_indices = @transform_6, window_bounds = array<i64: 1, 32>}, {pipeline_mode = #tpu.pipeline_mode<synchronous>, transform_indices = @transform_7, window_bounds = array<i64: 32, 64>}, {pipeline_mode = #tpu.pipeline_mode<synchronous>, transform_indices = @transform_8, window_bounds = array<i64: 1, 64>}, {transform_indices = @transform_9, window_bounds = array<i64: 2, 32>}, {transform_indices = @transform_10, window_bounds = array<i64: 2, 32>}]} {
    %c0 = arith.constant 0 : index
    %c0_0 = arith.constant 0 : index
    %0 = vector.load %arg1[%c0, %c0_0] : memref<2x64xf32, #tpu.memory_space<vmem>>, vector<2x64xf32>
    %c0_1 = arith.constant 0 : index
    %c0_2 = arith.constant 0 : index
    %c0_3 = arith.constant 0 : index
    %1 = vector.load %arg3[%c0_1, %c0_2, %c0_3] : memref<2x8x32xf32, #tpu.memory_space<vmem>>, vector<2x8x32xf32>
    %c0_4 = arith.constant 0 : index
    %c0_5 = arith.constant 0 : index
    %c0_6 = arith.constant 0 : index
    %2 = vector.load %arg4[%c0_4, %c0_5, %c0_6] : memref<2x8x32xf32, #tpu.memory_space<vmem>>, vector<2x8x32xf32>
    %c0_7 = arith.constant 0 : index
    %c0_8 = arith.constant 0 : index
    %3 = vector.load %arg5[%c0_7, %c0_8] : memref<64x192xf32, #tpu.memory_space<vmem>>, vector<64x192xf32>
    %cst = arith.constant dense<0.000000e+00> : vector<2x192xf32>
    %4 = tpu.matmul %0, %3, %cst {dimension_numbers = #tpu.dot_dimension_numbers<[1], [0], [0], [1], [0, 0, 1, 1], [], []>} : vector<2x64xf32>, vector<64x192xf32>, vector<2x192xf32> -> vector<2x192xf32>
    %c0_9 = arith.constant 0 : index
    %c0_10 = arith.constant 0 : index
    %5 = vector.load %arg6[%c0_9, %c0_10] : memref<1x192xf32, #tpu.memory_space<vmem>>, vector<1x192xf32>
    %6 = vector.broadcast %5 : vector<1x192xf32> to vector<2x192xf32>
    %7 = arith.addf %4, %6 : vector<2x192xf32>
    %8 = vector.extract_strided_slice %7 {offsets = [0, 0], sizes = [2, 160], strides = [1, 1]} : vector<2x192xf32> to vector<2x160xf32>
    %9 = vector.extract_strided_slice %7 {offsets = [0, 160], sizes = [2, 32], strides = [1, 1]} : vector<2x192xf32> to vector<2x32xf32>
    %10 = vector.shape_cast %9 : vector<2x32xf32> to vector<2x1x32xf32>
    %11 = vector.broadcast %10 : vector<2x1x32xf32> to vector<2x8x32xf32>
    %12 = arith.addf %2, %11 : vector<2x8x32xf32>
    %13 = math.tanh %12 : vector<2x8x32xf32>
    %c0_11 = arith.constant 0 : index
    %c0_12 = arith.constant 0 : index
    %14 = vector.load %arg7[%c0_11, %c0_12] : memref<1x32xf32, #tpu.memory_space<vmem>>, vector<1x32xf32>
    %15 = vector.shape_cast %14 : vector<1x32xf32> to vector<1x1x32xf32>
    %16 = vector.broadcast %15 : vector<1x1x32xf32> to vector<2x8x32xf32>
    %17 = arith.mulf %13, %16 : vector<2x8x32xf32>
    %cst_13 = arith.constant dense<0.000000e+00> : vector<2x8xf32>
    %18 = vector.multi_reduction <add>, %17, %cst_13 [2] : vector<2x8x32xf32> to vector<2x8xf32>
    %cst_14 = arith.constant dense<0xFF800000> : vector<2xf32>
    %19 = vector.multi_reduction <maximumf>, %18, %cst_14 [1] : vector<2x8xf32> to vector<2xf32>
    %20 = vector.shape_cast %19 : vector<2xf32> to vector<2x1xf32>
    %21 = vector.broadcast %20 : vector<2x1xf32> to vector<2x8xf32>
    %22 = arith.subf %18, %21 : vector<2x8xf32>
    %23 = math.exp %22 : vector<2x8xf32>
    %cst_15 = arith.constant dense<0.000000e+00> : vector<2xf32>
    %24 = vector.multi_reduction <add>, %23, %cst_15 [1] : vector<2x8xf32> to vector<2xf32>
    %25 = vector.shape_cast %24 : vector<2xf32> to vector<2x1xf32>
    %26 = tpu.reciprocal %25 {approx = true} : vector<2x1xf32> -> vector<2x1xf32>
    %27 = vector.broadcast %26 : vector<2x1xf32> to vector<2x8xf32>
    %28 = arith.mulf %23, %27 : vector<2x8xf32>
    %29 = vector.shape_cast %28 : vector<2x8xf32> to vector<2x8x1xf32>
    %30 = vector.broadcast %29 : vector<2x8x1xf32> to vector<2x8x32xf32>
    %31 = arith.mulf %30, %1 : vector<2x8x32xf32>
    %cst_16 = arith.constant dense<0.000000e+00> : vector<2x32xf32>
    %32 = vector.multi_reduction <add>, %31, %cst_16 [1] : vector<2x8x32xf32> to vector<2x32xf32>
    %33 = vector.extract_strided_slice %8 {offsets = [0, 0], sizes = [2, 96], strides = [1, 1]} : vector<2x160xf32> to vector<2x96xf32>
    %34 = arith.negf %33 : vector<2x96xf32>
    %35 = math.exp %34 : vector<2x96xf32>
    %cst_17 = arith.constant 1.000000e+00 : f32
    %36 = vector.broadcast %cst_17 : f32 to vector<2x96xf32>
    %37 = arith.addf %36, %35 : vector<2x96xf32>
    %38 = arith.divf %36, %37 : vector<2x96xf32>
    %39 = vector.extract_strided_slice %38 {offsets = [0, 0], sizes = [2, 32], strides = [1, 1]} : vector<2x96xf32> to vector<2x32xf32>
    %40 = vector.extract_strided_slice %38 {offsets = [0, 32], sizes = [2, 32], strides = [1, 1]} : vector<2x96xf32> to vector<2x32xf32>
    %41 = vector.extract_strided_slice %38 {offsets = [0, 64], sizes = [2, 32], strides = [1, 1]} : vector<2x96xf32> to vector<2x32xf32>
    %c0_18 = arith.constant 0 : index
    %c0_19 = arith.constant 0 : index
    %42 = vector.load %arg8[%c0_18, %c0_19] : memref<32x64xf32, #tpu.memory_space<vmem>>, vector<32x64xf32>
    %cst_20 = arith.constant dense<0.000000e+00> : vector<2x64xf32>
    %43 = tpu.matmul %32, %42, %cst_20 {dimension_numbers = #tpu.dot_dimension_numbers<[1], [0], [0], [1], [0, 0, 1, 1], [], []>} : vector<2x32xf32>, vector<32x64xf32>, vector<2x64xf32> -> vector<2x64xf32>
    %c0_21 = arith.constant 0 : index
    %c0_22 = arith.constant 0 : index
    %44 = vector.load %arg9[%c0_21, %c0_22] : memref<1x64xf32, #tpu.memory_space<vmem>>, vector<1x64xf32>
    %45 = vector.broadcast %44 : vector<1x64xf32> to vector<2x64xf32>
    %46 = arith.addf %43, %45 : vector<2x64xf32>
    %47 = vector.extract_strided_slice %8 {offsets = [0, 96], sizes = [2, 64], strides = [1, 1]} : vector<2x160xf32> to vector<2x64xf32>
    %48 = arith.addf %47, %46 : vector<2x64xf32>
    %49 = vector.extract_strided_slice %48 {offsets = [0, 0], sizes = [2, 32], strides = [1, 1]} : vector<2x64xf32> to vector<2x32xf32>
    %50 = vector.extract_strided_slice %48 {offsets = [0, 32], sizes = [2, 32], strides = [1, 1]} : vector<2x64xf32> to vector<2x32xf32>
    %51 = arith.maximumf %49, %50 : vector<2x32xf32>
    %c0_23 = arith.constant 0 : index
    %c0_24 = arith.constant 0 : index
    %52 = vector.load %arg2[%c0_23, %c0_24] : memref<2x32xf32, #tpu.memory_space<vmem>>, vector<2x32xf32>
    %53 = arith.mulf %40, %52 : vector<2x32xf32>
    %54 = arith.mulf %39, %51 : vector<2x32xf32>
    %55 = arith.addf %53, %54 : vector<2x32xf32>
    %56 = math.tanh %55 : vector<2x32xf32>
    %57 = arith.mulf %41, %56 : vector<2x32xf32>
    %c0_25 = arith.constant 0 : index
    %c0_26 = arith.constant 0 : index
    %58 = vector.load %arg10[%c0_25, %c0_26] : memref<2x32xf32, #tpu.memory_space<vmem>>, vector<2x32xf32>
    tpu.vector_store %arg10[%c0_25, %c0_26], %57 {strides = array<i32>} : memref<2x32xf32, #tpu.memory_space<vmem>>, vector<2x32xf32>,
    %c0_27 = arith.constant 0 : index
    %c0_28 = arith.constant 0 : index
    %59 = vector.load %arg11[%c0_27, %c0_28] : memref<2x32xf32, #tpu.memory_space<vmem>>, vector<2x32xf32>
    tpu.vector_store %arg11[%c0_27, %c0_28], %55 {strides = array<i32>} : memref<2x32xf32, #tpu.memory_space<vmem>>, vector<2x32xf32>,
    return
  }
  func.func @transform_0(%arg0: i32) -> (i32, i32) {
    %c0_i32 = arith.constant 0 : i32
    %c0_i32_0 = arith.constant 0 : i32
    return %arg0, %c0_i32 : i32, i32
  }
  func.func @transform_1(%arg0: i32) -> (i32, i32) {
    %c0_i32 = arith.constant 0 : i32
    %c0_i32_0 = arith.constant 0 : i32
    return %arg0, %c0_i32 : i32, i32
  }
  func.func @transform_2(%arg0: i32) -> (i32, i32, i32) {
    %c0_i32 = arith.constant 0 : i32
    %c0_i32_0 = arith.constant 0 : i32
    %c0_i32_1 = arith.constant 0 : i32
    return %arg0, %c0_i32, %c0_i32_0 : i32, i32, i32
  }
  func.func @transform_3(%arg0: i32) -> (i32, i32, i32) {
    %c0_i32 = arith.constant 0 : i32
    %c0_i32_0 = arith.constant 0 : i32
    %c0_i32_1 = arith.constant 0 : i32
    return %arg0, %c0_i32, %c0_i32_0 : i32, i32, i32
  }
  func.func @transform_4(%arg0: i32) -> (i32, i32) {
    %c0_i32 = arith.constant 0 : i32
    %c0_i32_0 = arith.constant 0 : i32
    %c0_i32_1 = arith.constant 0 : i32
    return %c0_i32, %c0_i32_0 : i32, i32
  }
  func.func @transform_5(%arg0: i32) -> (i32, i32) {
    %c0_i32 = arith.constant 0 : i32
    %c0_i32_0 = arith.constant 0 : i32
    %c0_i32_1 = arith.constant 0 : i32
    return %c0_i32, %c0_i32_0 : i32, i32
  }
  func.func @transform_6(%arg0: i32) -> (i32, i32) {
    %c0_i32 = arith.constant 0 : i32
    %c0_i32_0 = arith.constant 0 : i32
    %c0_i32_1 = arith.constant 0 : i32
    return %c0_i32, %c0_i32_0 : i32, i32
  }
  func.func @transform_7(%arg0: i32) -> (i32, i32) {
    %c0_i32 = arith.constant 0 : i32
    %c0_i32_0 = arith.constant 0 : i32
    %c0_i32_1 = arith.constant 0 : i32
    return %c0_i32, %c0_i32_0 : i32, i32
  }
  func.func @transform_8(%arg0: i32) -> (i32, i32) {
    %c0_i32 = arith.constant 0 : i32
    %c0_i32_0 = arith.constant 0 : i32
    %c0_i32_1 = arith.constant 0 : i32
    return %c0_i32, %c0_i32_0 : i32, i32
  }
  func.func @transform_9(%arg0: i32) -> (i32, i32) {
    %c0_i32 = arith.constant 0 : i32
    %c0_i32_0 = arith.constant 0 : i32
    return %arg0, %c0_i32 : i32, i32
  }
  func.func @transform_10(%arg0: i32) -> (i32, i32) {
    %c0_i32 = arith.constant 0 : i32
    %c0_i32_0 = arith.constant 0 : i32
    return %arg0, %c0_i32 : i32, i32
  }
}

</mosaic_0001>

<bundles_post_ra>
// kernel: tpu_custom_call.1
= control target key start
LH: loop header
LB: loop body
LE: loop exit
PB: predicated region body
PF: predicated region fallthrough
CT: control target
= control target key end

     0   :  { %16 = vsyncpa [#allocation3], 0  ;;  %s936_s0 = inlined_call_operand.hbm [shape: f32[2,64], index: 0, kind: input, shape index: {}]   ;;  %s937_s1 = inlined_call_operand.hbm [shape: f32[2,32], index: 1, kind: input, shape index: {}]   ;;  %s938_s2 = inlined_call_operand.hbm [shape: f32[2,8,32], index: 2, kind: input, shape index: {}]   ;;  %s939_s3 = inlined_call_operand.hbm [shape: f32[2,8,32], index: 3, kind: input, shape index: {}]   ;;  %s940_s4 = inlined_call_operand.hbm [shape: f32[64,192], index: 4, kind: input, shape index: {}]   ;;  %s941_s5 = inlined_call_operand.vmem [shape: f32[1,192], index: 5, kind: input, shape index: {}]   ;;  %s942_s6 = inlined_call_operand.vmem [shape: f32[1,32], index: 6, kind: input, shape index: {}]   ;;  %s943_s7 = inlined_call_operand.hbm [shape: f32[32,64], index: 7, kind: input, shape index: {}]   ;;  %s944_s8 = inlined_call_operand.vmem [shape: f32[1,64], index: 8, kind: input, shape index: {}]   ;;  %s945_s9 = inlined_call_operand.hbm [shape: f32[2,32], index: 9, kind: output, shape index: {0}]   ;;  %s946_s10 = inlined_call_operand.hbm [shape: f32[2,32], index: 10, kind: output, shape index: {1}]  }
   0x1   :  { %17 = vsyncpa [#allocation6], 0 }
   0x2   :  { %18 = vsyncpa [#allocation9], 0 }
   0x3   :  { %19 = vsyncpa [#allocation12], 0 }
   0x4   :  { %20 = vsyncpa [#allocation4], 0 }
   0x5   :  { %21 = vsyncpa [#allocation15], 0  ;;  %s774_s13 = smov [#allocation5]  }
   0x6   :  { %s38_s14 = sshll.u32 %s774_s13, 4  ;;  %s39_s14 = int_to_ptr.vmem [resolvable:$true] %s38_s14 }
   0x7   :  { %s610_s15 = scalar_lea.vmem %s39_s14, 32  ;;  %p615_p1 = scmp.lt.s32.totalorder %s39_s14, %s39_s14 }
   0x8   :  { %p611_p0 = scmp.ne.s32.totalorder %s39_s14, %s610_s15  ;;  %p616_p2 = scmp.lt.s32.totalorder %s610_s15, %s610_s15 }
   0xa   :  { %p617_p3 = por %p616_p2, %p615_p1 }
   0xc   :  { %p618_p4 = pnand %p617_p3, %p611_p0 }
   0xe   :  { %621 = shalt.err (!%p618_p4)
}
   0xf   :  { %41 = dma.hbm_to_vmem [thread:$0]  %s937_s1, 32, %s39_s14, [#allocation6]  }
  0x10   :  { %s775_s18 = smov [#allocation8]   ;;  %s776_s20 = smov [#allocation2]  }
  0x11   :  { %s59_s19 = sshll.u32 %s775_s18, 4  ;;  %s28_s21 = sshll.u32 %s776_s20, 4  ;;  %s60_s19 = int_to_ptr.vmem [resolvable:$true] %s59_s19  ;;  %s29_s21 = int_to_ptr.vmem [resolvable:$true] %s28_s21 }
  0x12   :  { %s630_s22 = scalar_lea.vmem %s60_s19, 256  ;;  %p635_p6 = scmp.lt.s32.totalorder %s60_s19, %s60_s19 }
  0x13   :  { %p631_p5 = scmp.ne.s32.totalorder %s60_s19, %s630_s22  ;;  %p636_p7 = scmp.lt.s32.totalorder %s630_s22, %s630_s22 }
  0x15   :  { %p637_p8 = por %p636_p7, %p635_p6 }
  0x17   :  { %p638_p9 = pnand %p637_p8, %p631_p5 }
  0x19   :  { %641 = shalt.err (!%p638_p9)
}
  0x1a   :  { %s777_s23 = smov 128   ;;  %s778_s24 = smov 8  }
  0x1b   :  { %65 = dma.hbm_to_vmem [thread:$0]  %s939_s3, 256, %s60_s19, [#allocation9], %s777_s23, %s777_s23, %s778_s24  }
  0x1c   :  { %s650_s1 = scalar_lea.vmem %s29_s21, 32  ;;  %p655_p11 = scmp.lt.s32.totalorder %s29_s21, %s29_s21 }
  0x1d   :  { %p651_p10 = scmp.ne.s32.totalorder %s29_s21, %s650_s1  ;;  %p656_p12 = scmp.lt.s32.totalorder %s650_s1, %s650_s1 }
  0x1f   :  { %p657_p13 = por %p656_p12, %p655_p11 }
  0x21   :  { %p658_p0 = pnand %p657_p13, %p651_p10 }
  0x23   :  { %661 = shalt.err (!%p658_p0)
}
  0x24   :  { %31 = dma.hbm_to_vmem [thread:$0]  %s936_s0, 32, %s29_s21, [#allocation3]  }
  0x25   :  { %s779_s29 = smov [#allocation7]   ;;  %s780_s11 = smov [#allocation10]  }
  0x26   :  { %s47_s30 = sshll.u32 %s779_s29, 4  ;;  %s71_s12 = sshll.u32 %s780_s11, 4  ;;  %s48_s30 = int_to_ptr.vmem [resolvable:$true] %s47_s30  ;;  %s72_s12 = int_to_ptr.vmem [resolvable:$true] %s71_s12 }
  0x27   :  { %s670_s13 = scalar_lea.vmem %s48_s30, 256  ;;  %p675_p2 = scmp.lt.s32.totalorder %s48_s30, %s48_s30 }
  0x28   :  { %p671_p1 = scmp.ne.s32.totalorder %s48_s30, %s670_s13  ;;  %p676_p3 = scmp.lt.s32.totalorder %s670_s13, %s670_s13 }
  0x2a   :  { %p677_p4 = por %p676_p3, %p675_p2 }
  0x2c   :  { %p678_p5 = pnand %p677_p4, %p671_p1 }
  0x2e   :  { %681 = shalt.err (!%p678_p5)
}
  0x2f   :  { %53 = dma.hbm_to_vmem [thread:$0]  %s938_s2, 256, %s48_s30, [#allocation6], %s777_s23, %s777_s23, %s778_s24  }
  0x30   :  { %s690_s0 = scalar_lea.vmem %s72_s12, 2048  ;;  %p695_p7 = scmp.lt.s32.totalorder %s72_s12, %s72_s12 }
  0x31   :  { %p691_p6 = scmp.ne.s32.totalorder %s72_s12, %s690_s0  ;;  %p696_p8 = scmp.lt.s32.totalorder %s690_s0, %s690_s0 }
  0x33   :  { %p697_p9 = por %p696_p8, %p695_p7 }
  0x35   :  { %p698_p10 = pnand %p697_p9, %p691_p6 }
  0x37   :  { %701 = shalt.err (!%p698_p10)
}
  0x38   :  { %s781_s15 = smov 256   ;;  %s782_s16 = smov 16  }
  0x39   :  { %77 = dma.hbm_to_vmem [thread:$0]  %s940_s4, 2048, %s72_s12, [#allocation9], %s781_s15, %s781_s15, %s782_s16  }
  0x3a   :  { %s783_s19 = smov [#allocation11]  }
  0x3b   :  { %s87_s20 = sshll.u32 %s783_s19, 4  ;;  %s88_s20 = int_to_ptr.vmem [resolvable:$true] %s87_s20 }
  0x3c   :  { %s710_s21 = scalar_lea.vmem %s88_s20, 512  ;;  %p715_p12 = scmp.lt.s32.totalorder %s88_s20, %s88_s20 }
  0x3d   :  { %p711_p11 = scmp.ne.s32.totalorder %s88_s20, %s710_s21  ;;  %p716_p13 = scmp.lt.s32.totalorder %s710_s21, %s710_s21 }
  0x3f   :  { %p717_p0 = por %p716_p13, %p715_p12 }
  0x41   :  { %p718_p1 = pnand %p717_p0, %p711_p11 }
  0x43   :  { %721 = shalt.err (!%p718_p1)
}
  0x44   :  { %93 = dma.hbm_to_vmem [thread:$0]  %s943_s7, 512, %s88_s20, [#allocation12], %s777_s23, %s777_s23, %s778_s24  }
  0x45   :  { %762 = dma.done.wait [#allocation3], 32  }
  0x46   :  { %763 = vsyncadd [#allocation3], 4294967264 }
  0x47   :  { %764 = dma.done.wait [#allocation6], 288  }
  0x48   :  { %765 = vsyncadd [#allocation6], 4294967008 }
  0x49   :  { %766 = dma.done.wait [#allocation9], 2304  }
  0x4a   :  { %767 = vsyncadd [#allocation9], 4294964992 }
  0x4b   :  { %768 = dma.done.wait [#allocation12], 512  }
  0x4c   :  { %769 = vsyncadd [#allocation12], 4294966784  ;;  %v784_v0 = vmov 0.0   ;;  %v134_v1 = vld [vmem:[#allocation10 + $0x78] sm:$0xff]  ;;  %v133_v2 = vld [vmem:[#allocation10 + $0x70] sm:$0xff]  ;;  %vm147_vm0 = vcmask 523264   ;;  %v137_v18 = vlaneseq }
  0x4d   :  { %215 = vmatprep.mubr.f32.mxu0 %v784_v0  ;;  %554 = vmatprep.subr.mxu1 %v784_v0  ;;  %v132_v3 = vld [vmem:[#allocation10 + $0x68] sm:$0xff]  ;;  %v131_v4 = vld [vmem:[#allocation10 + $0x60] sm:$0xff]  ;;  %v130_v5 = vld [vmem:[#allocation10 + $0x58] sm:$0xff]  ;;  %v785_v20 = vmov 1966171168   ;;  %vm272_vm1 = vcmask 261120  }
  0x4e   :  { %167 = vmatprep.subr.mxu0 %v134_v1  ;;  %v129_v6 = vld [vmem:[#allocation10 + $0x50] sm:$0xff]  ;;  %v128_v7 = vld [vmem:[#allocation10 + $0x48] sm:$0xff]  ;;  %v127_v8 = vld [vmem:[#allocation10 + $0x40] sm:$0xff]  ;;  %v138_v19 = vshrl.u32 %v137_v18, 7  ;;  %v224_v21 = vunpack.c.l.s4 %v785_v20  ;;  %v282_v50 = vand.u32 127, %v137_v18  ;;  %vm291_vm2 = vcmask 1041409  }
  0x4f   :  { %168 = vmatpush1.msra.mxu0 %v133_v2  ;;  %v126_v9 = vld [vmem:[#allocation10 + $0x38] sm:$0xff]  ;;  %v125_v10 = vld [vmem:[#allocation10 + $0x30] sm:$0xff]  ;;  %v124_v11 = vld [vmem:[#allocation10 + $0x28] sm:$0xff]  ;;  %vm294_vm3 = vcmask 58368   ;;  %v787_v58 = vmov 0   ;;  %vm788_vm4 = vmmov 0  }
  0x50   :  { %169 = vmatprep.subr.mxu0 %v132_v3  ;;  %v123_v12 = vld [vmem:[#allocation10 + $0x20] sm:$0xff]  ;;  %v122_v13 = vld [vmem:[#allocation10 + $0x18] sm:$0xff]  ;;  %v121_v14 = vld [vmem:[#allocation10 + $0x10] sm:$0xff]  ;;  %v877_v22 = vsub.s32 1, %v138_v19  ;;  %v225_v23 = vunpack.c.0.s8 %v224_v21  ;;  %v891_v31 = vsub.s32 0, %v138_v19  ;;  %v285_v52 = vsub.s32 %v282_v50, %v138_v19  ;;  %584 = vset.pattern.permute.xlu1 %v787_v58  ;;  %s789_s26 = smov 32  }
  0x51   :  { %170 = vmatpush1.msra.mxu0 %v131_v4  ;;  %v120_v15 = vld [vmem:[#allocation10 + $0x8] sm:$0xff]  ;;  %v119_v16 = vld [vmem:[#allocation10] sm:$0xff]  ;;  %v114_v17 = vld [vmem:[#allocation2] sm:$0x3]  ;;  %585 = vset.pattern.permute.xlu0 %v787_v58  ;;  %vm505_vm5 = vcmask 254976   ;;  %s791_s27 = smov 64  }
  0x52   :  { %171 = vmatprep.subr.mxu0 %v130_v5  ;;  %v882_v24 = vld [vmem:[%s941_s5] sm:$0x3]  ;;  %v228_v27 = vsub.s32 %v225_v23, %v138_v19  ;;  %s786_s5 = smov 96   ;;  %v117_v37 = vld [vmem:[#allocation8] sm:$0xff]  ;;  %v383_v19 = vld [vmem:[#allocation11 + $0x8] sm:$0xff]  ;;  %562 = vmatprep.mubr.msk.f32.mxu1 %vm788_vm4, %v784_v0 }
  0x53   :  { %172 = vmatpush1.msra.mxu0 %v129_v6  ;;  %v144_v25 = vrot.slane %v882_v24, %v877_v22  ;;  %v118_v40 = vld [vmem:[#allocation8 + $0x8] sm:$0xff]  ;;  %v384_v18 = vld [vmem:[#allocation11 + $0x10] sm:$0xff]  ;;  %v382_v20 = vld [vmem:[#allocation11] sm:$0xff] }
  0x54   :  { %173 = vmatprep.subr.mxu0 %v128_v7  ;;  %v545_v43 = vld [vmem:[%s942_s6] ss:$0 sm:$0xff]  ;;  %v116_v21 = vld [vmem:[#allocation7 + $0x8] sm:$0xff] }
  0x55   :  { %174 = vmatpush1.msra.mxu0 %v127_v8 }
  0x56   :  { %175 = vmatprep.subr.mxu0 %v126_v9 }
  0x57   :  { %176 = vmatpush1.msra.mxu0 %v125_v10 }
  0x58   :  { %177 = vmatprep.subr.mxu0 %v124_v11 }
  0x59   :  { %178 = vmatpush1.msra.mxu0 %v123_v12 }
  0x5a   :  { %179 = vmatprep.subr.mxu0 %v122_v13 }
  0x5b   :  { %180 = vmatpush1.msra.mxu0 %v121_v14 }
  0x5c   :  { %181 = vmatprep.subr.mxu0 %v120_v15 }
  0x5d   :  { %182 = vmatpush1.msra.mxu0 %v119_v16 }
  0x5e   :  { %544 = vmatmul.mubr.msk.f32.vlgmr.msra.gmra.mxu0 %vm147_vm0, %v114_v17  ;;  %v385_v17 = vld [vmem:[#allocation11 + $0x18] sm:$0xff] }
  0x5f   :  { %555 = vmatpush3.msra.mxu1 %v385_v17 }
  0x60   :  { %556 = vmatprep.subr.mxu1 %v784_v0 }
  0x61   :  { %557 = vmatpush3.msra.mxu1 %v384_v18 }
  0x62   :  { %558 = vmatprep.subr.mxu1 %v784_v0 }
  0x63   :  { %559 = vmatpush3.msra.mxu1 %v383_v19 }
  0x64   :  { %560 = vmatprep.subr.mxu1 %v784_v0 }
  0x65   :  { %561 = vmatpush3.msra.mxu1 %v382_v20 }
 0x11e   :  { %v886_v26 = vpop.f32.mrf.mxu0 }
 0x120   :  { %v219_v28 = vpop.f32.mrf.mxu0 }
 0x121   :  { %v888_v29 = vadd.f32 %v219_v28, %v144_v25 }
 0x123   :  { %v229_v30 = vrot.slane %v888_v29, %v228_v27 }
 0x125   :  { %v230_v32 = vcombine.high %v229_v30, %v229_v30  ;;  %v237_v33 = vrot.slane %v229_v30, %v228_v27 }
 0x127   :  { %v248_v34 = vrot.slane %v237_v33, %v891_v31  ;;  %v244_v35 = vrot.slane %v230_v32, %v228_v27 }
 0x129   :  { %253 = vrot.lane.b32.xlu0 %v248_v34, %s786_s5  ;;  %v252_v36 = vrot.slane %v244_v35, %v891_v31 }
 0x12d   :  { %255 = vrot.lane.b32.xlu0 %v252_v36, %s786_s5 }
 0x19b   :  { %v254_v38 = vpop.permute.xlu0 %253 }
 0x19c   :  { %v259_v39 = vadd.f32 %v254_v38, %v117_v37 }
 0x19e   :  { %586 = vtanh.f32 %v259_v39 }
 0x19f   :  { %v256_v41 = vpop.permute.xlu0 %255 }
 0x1a0   :  { %v260_v42 = vadd.f32 %v256_v41, %v118_v40 }
 0x1a2   :  { %588 = vtanh.f32 %v260_v42 }
 0x1ab   :  { %v587_v44 = vpop.eup %586 }
 0x1ac   :  { %v270_v45 = vmul.f32 %v587_v44, %v545_v43 }
 0x1ae   :  { %v273_v46 = vsel %vm272_vm1, %v270_v45, 0.0  ;;  %v547_v45 = vld [vmem:[%s944_s8] ss:$0 sm:$0xff]  ;;  %s790_s8 = smov [#allocation14]  }
 0x1af   :  { %v589_v47 = vpop.eup %588  ;;  %274 = vadd.xlane.f32.xlu1 %v273_v46  ;;  %s528_s1 = sshll.u32 %s790_s8, 4  ;;  %s529_s1 = int_to_ptr.vmem [resolvable:$true] %s528_s1 }
 0x1b0   :  { %v271_v48 = vmul.f32 %v589_v47, %v545_v43  ;;  %s722_s28 = scalar_lea.vmem %s529_s1, 32  ;;  %p727_p3 = scmp.lt.s32.totalorder %s529_s1, %s529_s1 }
 0x1b1   :  { %p723_p2 = scmp.ne.s32.totalorder %s529_s1, %s722_s28  ;;  %p728_p4 = scmp.lt.s32.totalorder %s722_s28, %s722_s28 }
 0x1b2   :  { %v276_v49 = vsel %vm272_vm1, %v271_v48, 0.0 }
 0x1b3   :  { %277 = vadd.xlane.f32.xlu1 %v276_v49  ;;  %p729_p5 = por %p728_p4, %p727_p3 }
 0x1b5   :  { %p730_p6 = pnand %p729_p5, %p723_p2 }
 0x238   :  { %v275_v51 = vpop.xlane.xlu1 %274 }
 0x239   :  { %v286_v54 = vrot.slane %v275_v51, %v285_v52 }
 0x23c   :  { %v278_v53 = vpop.xlane.xlu1 %277 }
 0x23d   :  { %v290_v55 = vrot.slane %v278_v53, %v285_v52 }
 0x23f   :  { %v292_v56 = vsel %vm291_vm2, %v290_v55, %v286_v54 }
 0x240   :  { %v295_v57 = vsel %vm294_vm3, %v292_v56, -inf }
 0x241   :  { %296 = vmax.xlane.f32.xlu0 %v295_v57 }
 0x2ca   :  { %v297_v59 = vpop.xlane.xlu0 %296 }
 0x2cb   :  { %v302_v60 = vrot.slane %v297_v59, %v891_v31  ;;  %v306_v61 = vrot.slane %v297_v59, %v877_v22 }
 0x2cd   :  { %v309_v62 = vsub.f32 %v275_v51, %v302_v60  ;;  %v310_v63 = vsub.f32 %v278_v53, %v306_v61  ;;  %v479_v51 = vld [vmem:[#allocation5] sm:$0x3] }
 0x2cf   :  { %v311_v1 = vmul.f32 1.442695, %v309_v62  ;;  %v313_v2 = vmul.f32 1.442695, %v310_v63 }
 0x2d1   :  { %590 = vpow2.f32 %v311_v1 }
 0x2d2   :  { %592 = vpow2.f32 %v313_v2 }
 0x2de   :  { %v591_v3 = vpop.eup %590 }
 0x2df   :  { %318 = vperm.xlu1 %584, %v591_v3   ;;  %v593_v4 = vpop.eup %592 }
 0x2e3   :  { %321 = vperm.xlu1 %584, %v593_v4  }
 0x35a   :  { %v319_v5 = vpop.permute.xlu1 %318 }
 0x35b   :  { %v326_v7 = vrot.slane %v319_v5, %v285_v52 }
 0x35e   :  { %v322_v6 = vpop.permute.xlu1 %321 }
 0x35f   :  { %v330_v8 = vrot.slane %v322_v6, %v285_v52  ;;  %v140_v52 = vrot.slane %v882_v24, %v891_v31 }
 0x361   :  { %v331_v9 = vsel %vm291_vm2, %v330_v8, %v326_v7  ;;  %v218_v53 = vadd.f32 %v886_v26, %v140_v52 }
 0x362   :  { %v333_v10 = vsel %vm294_vm3, %v331_v9, 0.0 }
 0x363   :  { %334 = vadd.xlane.f32.xlu1 %v333_v10  ;;  %v546_v57 = vmul.f32 -1.442695, %v218_v53 }
 0x3ec   :  { %v335_v11 = vpop.xlane.xlu1 %334 }
 0x3ed   :  { %594 = vrcp.f32 %v335_v11 }
 0x3ee   :  { %596 = vpow2.f32 %v546_v57 }
 0x3fa   :  { %v595_v12 = vpop.eup %594 }
 0x3fb   :  { %v345_v13 = vrot.slane %v595_v12, %v877_v22  ;;  %v341_v14 = vrot.slane %v595_v12, %v891_v31  ;;  %v115_v22 = vld [vmem:[#allocation7] sm:$0xff]  ;;  %v597_v58 = vpop.eup %596 }
 0x3fc   :  { %v379_v59 = vadd.f32 1.0, %v597_v58 }
 0x3fd   :  { %v349_v15 = vmul.f32 %v593_v4, %v345_v13  ;;  %v348_v16 = vmul.f32 %v591_v3, %v341_v14 }
 0x3fe   :  { %598 = vrcp.f32 %v379_v59 }
 0x3ff   :  { %357 = vperm.xlu1 %584, %v349_v15   ;;  %352 = vperm.xlu0 %585, %v348_v16  }
 0x47a   :  { %v358_v23 = vpop.permute.xlu1 %357  ;;  %v353_v25 = vpop.permute.xlu0 %352 }
 0x47b   :  { %v361_v27 = vmul.f32 %v358_v23, %v116_v21  ;;  %v360_v28 = vmul.f32 %v353_v25, %v115_v22 }
 0x47d   :  { %v369_v30 = vsel %vm272_vm1, %v361_v27, 0.0  ;;  %v362_v32 = vsel %vm272_vm1, %v360_v28, 0.0 }
 0x47e   :  { %v370_v33 = vrot.slane %v369_v30, 4  ;;  %v363_v34 = vrot.slane %v362_v32, 4 }
 0x480   :  { %v371_v35 = vadd.f32 %v370_v33, %v369_v30  ;;  %v364_v36 = vadd.f32 %v363_v34, %v362_v32 }
 0x482   :  { %v372_v37 = vrot.slane %v371_v35, 2  ;;  %v365_v38 = vrot.slane %v364_v36, 2 }
 0x484   :  { %v373_v39 = vadd.f32 %v372_v37, %v371_v35  ;;  %v366_v40 = vadd.f32 %v365_v38, %v364_v36 }
 0x486   :  { %v374_v0 = vrot.slane %v373_v39, 1  ;;  %v367_v41 = vrot.slane %v366_v40, 1 }
 0x488   :  { %v375_v42 = vadd.f32 %v374_v0, %v373_v39  ;;  %v368_v43 = vadd.f32 %v367_v41, %v366_v40 }
 0x48a   :  { %v395_v44 = vsel %vm291_vm2, %v375_v42, %v368_v43 }
 0x48b   :  { %563 = vmatmul.mubr.msk.f32.vlgmr.msra.gmra.mxu1 %vm272_vm1, %v395_v44 }
 0x54b   :  { %v464_v46 = vpop.f32.mrf.mxu1 }
 0x54c   :  { %v465_v47 = vadd.f32 %v547_v45, %v464_v46 }
 0x54d   :  { %v564_v48 = vpop.f32.mrf.mxu1 }
 0x54e   :  { %469 = vrot.lane.b32.xlu1 %v465_v47, %s786_s5 }
 0x5c0   :  { %v470_v49 = vpop.permute.xlu1 %469 }
 0x5c1   :  { %v473_v50 = vadd.f32 %v470_v49, %v888_v29  ;;  %v472_v54 = vadd.f32 %v470_v49, %v218_v53  ;;  %v599_v29 = vpop.eup %598 }
 0x5c3   :  { %475 = vrot.lane.b32.xlu0 %v473_v50, %s786_s5 }
 0x5c7   :  { %481 = vrot.lane.b32.xlu0 %v479_v51, %s789_s26 }
 0x635   :  { %v476_v55 = vpop.permute.xlu0 %475 }
 0x636   :  { %v478_v56 = vmax.f32 %v472_v54, %v476_v55 }
 0x638   :  { %486 = vrot.lane.b32.xlu1 %v478_v56, %s789_s26 }
 0x639   :  { %v482_v62 = vpop.permute.xlu0 %481 }
 0x63a   :  { %v484_v63 = vmul.f32 %v599_v29, %v482_v62 }
 0x6aa   :  { %v487_v60 = vpop.permute.xlu1 %486 }
 0x6ab   :  { %v489_v61 = vmul.f32 %v599_v29, %v487_v60 }
 0x6ad   :  { %491 = vrot.lane.b32.xlu1 %v489_v61, %s789_s26 }
 0x71f   :  { %v492_v1 = vpop.permute.xlu1 %491 }
 0x720   :  { %v494_v2 = vadd.f32 %v492_v1, %v484_v63 }
 0x722   :  { %600 = vtanh.f32 %v494_v2 }
 0x72f   :  { %v601_v24 = vpop.eup %600 }
 0x730   :  { %497 = vrot.lane.b32.xlu0 %v601_v24, %s789_s26 }
 0x734   :  { %508 = vrot.lane.b32.xlu0 %v494_v2, %s786_s5 }
 0x7a2   :  { %v498_v26 = vpop.permute.xlu0 %497 }
 0x7a3   :  { %v500_v31 = vmul.f32 %v599_v29, %v498_v26 }
 0x7a5   :  { %502 = vrot.lane.b32.xlu1 %v500_v31, %s791_s27 }
 0x7a6   :  { %v509_v3 = vpop.permute.xlu0 %508 }
 0x7a7   :  { %511 = vst.msk [vmem:[#allocation14] sm:$0x3] %vm505_vm5, %v509_v3 }
 0x7a8   :  { %733 = shalt.err (!%p730_p6)
}
 0x7a9   :  { %531 = dma.vmem_to_hbm [thread:$0]  %s529_s1, 32, %s946_s10, [#allocation15]  }
 0x7aa   :  { %s792_s11 = smov [#allocation13]  }
 0x7ab   :  { %s518_s12 = sshll.u32 %s792_s11, 4  ;;  %s519_s12 = int_to_ptr.vmem [resolvable:$true] %s518_s12 }
 0x7ac   :  { %s742_s13 = scalar_lea.vmem %s519_s12, 32  ;;  %p747_p8 = scmp.lt.s32.totalorder %s519_s12, %s519_s12 }
 0x7ad   :  { %p743_p7 = scmp.ne.s32.totalorder %s519_s12, %s742_s13  ;;  %p748_p9 = scmp.lt.s32.totalorder %s742_s13, %s742_s13 }
 0x7af   :  { %p749_p10 = por %p748_p9, %p747_p8 }
 0x7b1   :  { %p750_p11 = pnand %p749_p10, %p743_p7 }
 0x817   :  { %v503_v4 = vpop.permute.xlu1 %502 }
 0x818   :  { %506 = vst.msk [vmem:[#allocation13] sm:$0x3] %vm505_vm5, %v503_v4 }
 0x819   :  { %753 = shalt.err (!%p750_p11)
}
 0x81a   :  { %521 = dma.vmem_to_hbm [thread:$0]  %s519_s12, 32, %s945_s9, [#allocation4]  }
 0x81b   :  { %770 = dma.done.wait [#allocation4], 32  }
 0x81c   :  { %771 = vsyncadd [#allocation4], 4294967264 }
 0x81d   :  { %772 = dma.done.wait [#allocation15], 32  }
 0x81e   :  { %773 = vsyncadd [#allocation15], 4294967264 }
 0x81f   :  { %538 = vsyncpa [#allocation3], 1 }
 0x820   :  { %539 = vsyncpa [#allocation6], 1 }
 0x821   :  { %540 = vsyncpa [#allocation9], 1 }
 0x822   :  { %541 = vsyncpa [#allocation12], 1 }
 0x823   :  { %542 = vsyncpa [#allocation4], 1 }
 0x824   :  { %543 = vsyncpa [#allocation15], 1 }

</bundles_post_ra>
